<compile_context>
chip_gen: v7x
topology: tpu7x:2x2x1
jax: 0.10.0
libtpu: 0.0.40
codegen_flags: <defaults>
</compile_context>

<pallas_src>
import functools
import math

import jax
import jax.numpy as jnp
from jax.experimental import pallas as pl
from jax.experimental.pallas import tpu as pltpu


def _round_up(n, m):
    return ((n + m - 1) // m) * m


def mha_kernel(x_ref, wqkv_ref, wo_ref, bo_ref, o_ref, *, n_head, hb):
    T = x_ref.shape[1]
    dmp = o_ref.shape[2]

    # ---- fused QKV projection: one lane-dense MXU matmul (bf16 x bf16 -> f32).
    x2 = x_ref[0]                                                  # (T, E) bf16
    qkv = jnp.dot(x2, wqkv_ref[...],
                  preferred_element_type=jnp.float32)              # (T, 3*n_head*hb) f32

    # Additive causal mask, built once in f32 and reused by every head.
    row = jax.lax.broadcasted_iota(jnp.int32, (T, T), 0)
    col = jax.lax.broadcasted_iota(jnp.int32, (T, T), 1)
    mask = jnp.where(col <= row, 0.0, -1e30).astype(jnp.float32)   # (T, T)

    acc = jnp.zeros((T, dmp), jnp.float32)
    for h in range(n_head):                                        # static unroll, n_head small
        # 128-lane-aligned static views into the padded qkv slab.
        q = qkv[:, (0 * n_head + h) * hb:(0 * n_head + h + 1) * hb]
        k = qkv[:, (1 * n_head + h) * hb:(1 * n_head + h + 1) * hb]
        v = qkv[:, (2 * n_head + h) * hb:(2 * n_head + h + 1) * hb]

        # q.k^T: scale already folded into the q weights; contraction over the
        # zero-padded head dim is exact.
        s = jax.lax.dot_general(q.astype(jnp.bfloat16), k.astype(jnp.bfloat16),
                                (((1,), (1,)), ((), ())),
                                preferred_element_type=jnp.float32)  # (T, T)
        s = s + mask

        # Numerically stable softmax in f32; approx reciprocal -> EUP slot.
        s = s - jnp.max(s, axis=-1, keepdims=True)
        p = jnp.exp(s)
        p = p * pl.reciprocal(jnp.sum(p, axis=-1, keepdims=True), approx=True)

        o = jnp.dot(p.astype(jnp.bfloat16), v.astype(jnp.bfloat16),
                    preferred_element_type=jnp.float32)            # (T, hb) f32

        # Accumulate this head's contribution to the output projection
        # (replaces concat + one big matmul).
        acc = acc + jnp.dot(o.astype(jnp.bfloat16), wo_ref[h],
                            preferred_element_type=jnp.float32)    # (T, dmp)

    o_ref[...] = (acc + bo_ref[...])[None].astype(o_ref.dtype)     # lane-dense store


def multi_head_attention(x, wq_h, wk_h, wv_h, wo, bo):
    """x: (B,T,E) f32; wq_h/wk_h/wv_h: (n_head,E,d_head); wo: (n_head*d_head,d_model); bo: (d_model,)."""
    B, T, E = x.shape
    n_head, _, d_head = wq_h.shape
    d_model = wo.shape[1]
    assert wo.shape == (n_head * d_head, d_model)
    assert bo.shape == (d_model,)

    hb = _round_up(d_head, 128)    # lane-aligned per-head block width
    dmp = _round_up(d_model, 128)  # lane-dense output width
    scale = 1.0 / math.sqrt(d_head)

    # Fused, zero-padded, scale-folded QKV weight: columns =
    # [q_h0 .. q_h{n-1} | k_h0 .. | v_h0 ..], each head block `hb` lanes wide.
    def pad_heads(w, s=1.0):
        wp = jnp.zeros((n_head, E, hb), jnp.float32).at[:, :, :d_head].set(w * s)
        return jnp.transpose(wp, (1, 0, 2)).reshape(E, n_head * hb)

    wqkv_p = jnp.concatenate(
        [pad_heads(wq_h, scale), pad_heads(wk_h), pad_heads(wv_h)],
        axis=1).astype(jnp.bfloat16)                               # (E, 3*n_head*hb)

    # Per-head output-projection slabs, zero-padded to (hb, dmp).
    wo_p = jnp.zeros((n_head, hb, dmp), jnp.float32)
    wo_p = wo_p.at[:, :d_head, :d_model].set(wo.reshape(n_head, d_head, d_model))
    wo_p = wo_p.astype(jnp.bfloat16)
    bo_p = jnp.zeros((1, dmp), jnp.float32).at[0, :d_model].set(bo)

    x_bf = x.astype(jnp.bfloat16)

    flops = (2 * B * T * E * (3 * n_head * hb)          # fused QKV projection
             + n_head * B * 2 * (2 * T * T * hb)        # q.k^T and p@v per head
             + n_head * B * (2 * T * hb * dmp))         # per-head projection accumulate
    bytes_accessed = (x_bf.size * 2 + wqkv_p.size * 2 + wo_p.size * 2
                      + bo_p.size * 4 + B * T * dmp * 4)
    cost = pl.CostEstimate(flops=int(flops),
                           transcendentals=int(B * n_head * T * T),
                           bytes_accessed=int(bytes_accessed))

    kernel = functools.partial(mha_kernel, n_head=n_head, hb=hb)
    out_p = pl.pallas_call(
        kernel,
        out_shape=jax.ShapeDtypeStruct((B, T, dmp), x.dtype),
        # One program per batch element; "parallel" lets v7x's two TensorCores
        # split the batch (no effect on single-TC v5e/v6e).  Weights have
        # constant index_maps so they remain resident in VMEM across steps.
        grid=(B,),
        in_specs=[
            pl.BlockSpec((1, T, E), lambda b: (b, 0, 0)),
            pl.BlockSpec((E, 3 * n_head * hb), lambda b: (0, 0)),
            pl.BlockSpec((n_head, hb, dmp), lambda b: (0, 0, 0)),
            pl.BlockSpec((1, dmp), lambda b: (0, 0)),
        ],
        out_specs=pl.BlockSpec((1, T, dmp), lambda b: (b, 0, 0)),
        compiler_params=pltpu.CompilerParams(
            dimension_semantics=("parallel",),
            vmem_limit_bytes=32 * 1024 * 1024),
        cost_estimate=cost,
    )(x_bf, wqkv_p, wo_p, bo_p)

    return out_p[:, :, :d_model]


def multi_head_attention_reference(x, wq_h, wk_h, wv_h, wo, bo):
    """Pure-JAX f32 reference matching the PyTorch module in eval mode."""
    n_head, _, d_head = wq_h.shape
    T = x.shape[1]
    mask = jnp.tril(jnp.ones((T, T), dtype=bool))
    outs = []
    for h in range(n_head):
        q = x @ wq_h[h]
        k = x @ wk_h[h]
        v = x @ wv_h[h]
        s = jnp.einsum("btd,bsd->bts", q, k) / math.sqrt(d_head)
        s = jnp.where(mask[None], s, -jnp.inf)
        p = jax.nn.softmax(s, axis=-1)
        outs.append(jnp.einsum("bts,bsd->btd", p, v))
    cat = jnp.concatenate(outs, axis=-1)
    return cat @ wo + bo[None, None, :]


if __name__ == "__main__":
    # Small shapes consistent with the module:
    # batch=2, seq=8, d_embed=32, d_head=16, n_head=4, d_model=32
    B, T = 2, 8
    d_embed, d_head, n_head, d_model = 32, 16, 4, 32
    NH = n_head * d_head

    key = jax.random.PRNGKey(0)
    kx, kq, kk, kv, kwo, kbo = jax.random.split(key, 6)
    x = jax.random.normal(kx, (B, T, d_embed), dtype=jnp.float32)

    # Deterministic "nn.Linear(bias=False)"-style per-head weights, stored
    # transposed as (d_embed, d_head).
    bound = 1.0 / math.sqrt(d_embed)
    wq_h = jax.random.uniform(kq, (n_head, d_embed, d_head), jnp.float32, -bound, bound)
    wk_h = jax.random.uniform(kk, (n_head, d_embed, d_head), jnp.float32, -bound, bound)
    wv_h = jax.random.uniform(kv, (n_head, d_embed, d_head), jnp.float32, -bound, bound)
    bound_o = 1.0 / math.sqrt(NH)
    wo = jax.random.uniform(kwo, (NH, d_model), jnp.float32, -bound_o, bound_o)
    bo = jax.random.uniform(kbo, (d_model,), jnp.float32, -bound_o, bound_o)

    out = multi_head_attention(x, wq_h, wk_h, wv_h, wo, bo)
    out = jax.block_until_ready(out)

    ref = multi_head_attention_reference(x, wq_h, wk_h, wv_h, wo, bo)
    assert out.shape == (B, T, d_model)
    # bf16 MXU operands (f32 accumulation) => compare to the f32 reference at
    # bf16-level tolerance.
    err = float(jnp.max(jnp.abs(out - ref)))
    assert jnp.allclose(out, ref, atol=2e-2, rtol=2e-2), err

    print("KERNEL_OK")
</pallas_src>

<mosaic_0001>
module attributes {stable_mosaic.version = 11 : i64} {
  func.func @mha_kernel(%arg0: i32, %arg1: memref<1x8x32xbf16, #tpu.memory_space<vmem>>, %arg2: memref<32x1536xbf16, #tpu.memory_space<vmem>>, %arg3: memref<4x128x128xbf16, #tpu.memory_space<vmem>>, %arg4: memref<1x128xf32, #tpu.memory_space<vmem>>, %arg5: memref<1x8x128xf32, #tpu.memory_space<vmem>>) attributes {dimension_semantics = [#tpu.dimension_semantics<parallel>], iteration_bounds = array<i64: 2>, scalar_prefetch = 0 : i64, scratch_operands = 0 : i64, tpu.core_type = #tpu.core_type<tc>, window_params = [{transform_indices = @transform_0, window_bounds = array<i64: 1, 8, 32>}, {pipeline_mode = #tpu.pipeline_mode<synchronous>, transform_indices = @transform_1, window_bounds = array<i64: 32, 1536>}, {pipeline_mode = #tpu.pipeline_mode<synchronous>, transform_indices = @transform_2, window_bounds = array<i64: 4, 128, 128>}, {pipeline_mode = #tpu.pipeline_mode<synchronous>, transform_indices = @transform_3, window_bounds = array<i64: 1, 128>}, {transform_indices = @transform_4, window_bounds = array<i64: 1, 8, 128>}]} {
    %c0 = arith.constant 0 : index
    %c0_0 = arith.constant 0 : index
    %c0_1 = arith.constant 0 : index
    %0 = vector.load %arg1[%c0, %c0_0, %c0_1] : memref<1x8x32xbf16, #tpu.memory_space<vmem>>, vector<1x8x32xbf16>
    %1 = vector.shape_cast %0 : vector<1x8x32xbf16> to vector<8x32xbf16>
    %c0_2 = arith.constant 0 : index
    %c0_3 = arith.constant 0 : index
    %2 = vector.load %arg2[%c0_2, %c0_3] : memref<32x1536xbf16, #tpu.memory_space<vmem>>, vector<32x1536xbf16>
    %cst = arith.constant dense<0.000000e+00> : vector<8x1536xf32>
    %3 = tpu.matmul %1, %2, %cst {dimension_numbers = #tpu.dot_dimension_numbers<[1], [0], [0], [1], [0, 0, 1, 1], [], []>} : vector<8x32xbf16>, vector<32x1536xbf16>, vector<8x1536xf32> -> vector<8x1536xf32>
    %4 = tpu.iota {dimensions = array<i32: 0>} : vector<8x8xi32>
    %5 = tpu.iota {dimensions = array<i32: 1>} : vector<8x8xi32>
    %6 = arith.cmpi sle, %5, %4 : vector<8x8xi32>
    %cst_4 = arith.constant 0.000000e+00 : f32
    %cst_5 = arith.constant -1.000000e+30 : f32
    %7 = vector.broadcast %cst_4 : f32 to vector<8x8xf32>
    %8 = vector.broadcast %cst_5 : f32 to vector<8x8xf32>
    %9 = arith.select %6, %7, %8 : vector<8x8xi1>, vector<8x8xf32>
    %cst_6 = arith.constant 0.000000e+00 : f32
    %10 = vector.broadcast %cst_6 : f32 to vector<8x128xf32>
    %11 = vector.extract_strided_slice %3 {offsets = [0, 0], sizes = [8, 128], strides = [1, 1]} : vector<8x1536xf32> to vector<8x128xf32>
    %12 = vector.extract_strided_slice %3 {offsets = [0, 512], sizes = [8, 128], strides = [1, 1]} : vector<8x1536xf32> to vector<8x128xf32>
    %13 = vector.extract_strided_slice %3 {offsets = [0, 1024], sizes = [8, 128], strides = [1, 1]} : vector<8x1536xf32> to vector<8x128xf32>
    %14 = arith.truncf %11 : vector<8x128xf32> to vector<8x128xbf16>
    %15 = arith.truncf %12 : vector<8x128xf32> to vector<8x128xbf16>
    %cst_7 = arith.constant dense<0.000000e+00> : vector<8x8xf32>
    %16 = tpu.matmul %14, %15, %cst_7 {dimension_numbers = #tpu.dot_dimension_numbers<[1], [1], [0], [0], [0, 0, 1, 0], [], []>} : vector<8x128xbf16>, vector<8x128xbf16>, vector<8x8xf32> -> vector<8x8xf32>
    %17 = arith.addf %16, %9 : vector<8x8xf32>
    %cst_8 = arith.constant dense<0xFF800000> : vector<8xf32>
    %18 = vector.multi_reduction <maximumf>, %17, %cst_8 [1] : vector<8x8xf32> to vector<8xf32>
    %19 = vector.shape_cast %18 : vector<8xf32> to vector<8x1xf32>
    %20 = vector.broadcast %19 : vector<8x1xf32> to vector<8x8xf32>
    %21 = arith.subf %17, %20 : vector<8x8xf32>
    %22 = math.exp %21 : vector<8x8xf32>
    %cst_9 = arith.constant dense<0.000000e+00> : vector<8xf32>
    %23 = vector.multi_reduction <add>, %22, %cst_9 [1] : vector<8x8xf32> to vector<8xf32>
    %24 = vector.shape_cast %23 : vector<8xf32> to vector<8x1xf32>
    %25 = tpu.reciprocal %24 {approx = true} : vector<8x1xf32> -> vector<8x1xf32>
    %26 = vector.broadcast %25 : vector<8x1xf32> to vector<8x8xf32>
    %27 = arith.mulf %22, %26 : vector<8x8xf32>
    %28 = arith.truncf %27 : vector<8x8xf32> to vector<8x8xbf16>
    %29 = arith.truncf %13 : vector<8x128xf32> to vector<8x128xbf16>
    %cst_10 = arith.constant dense<0.000000e+00> : vector<8x128xf32>
    %30 = tpu.matmul %28, %29, %cst_10 {dimension_numbers = #tpu.dot_dimension_numbers<[1], [0], [0], [1], [0, 0, 1, 1], [], []>} : vector<8x8xbf16>, vector<8x128xbf16>, vector<8x128xf32> -> vector<8x128xf32>
    %31 = arith.truncf %30 : vector<8x128xf32> to vector<8x128xbf16>
    %c0_11 = arith.constant 0 : index
    %c0_12 = arith.constant 0 : index
    %c0_13 = arith.constant 0 : index
    %32 = vector.load %arg3[%c0_11, %c0_12, %c0_13] : memref<4x128x128xbf16, #tpu.memory_space<vmem>>, vector<1x128x128xbf16>
    %33 = vector.shape_cast %32 : vector<1x128x128xbf16> to vector<128x128xbf16>
    %cst_14 = arith.constant dense<0.000000e+00> : vector<8x128xf32>
    %34 = tpu.matmul %31, %33, %cst_14 {dimension_numbers = #tpu.dot_dimension_numbers<[1], [0], [0], [1], [0, 0, 1, 1], [], []>} : vector<8x128xbf16>, vector<128x128xbf16>, vector<8x128xf32> -> vector<8x128xf32>
    %35 = arith.addf %10, %34 : vector<8x128xf32>
    %36 = vector.extract_strided_slice %3 {offsets = [0, 128], sizes = [8, 128], strides = [1, 1]} : vector<8x1536xf32> to vector<8x128xf32>
    %37 = vector.extract_strided_slice %3 {offsets = [0, 640], sizes = [8, 128], strides = [1, 1]} : vector<8x1536xf32> to vector<8x128xf32>
    %38 = vector.extract_strided_slice %3 {offsets = [0, 1152], sizes = [8, 128], strides = [1, 1]} : vector<8x1536xf32> to vector<8x128xf32>
    %39 = arith.truncf %36 : vector<8x128xf32> to vector<8x128xbf16>
    %40 = arith.truncf %37 : vector<8x128xf32> to vector<8x128xbf16>
    %cst_15 = arith.constant dense<0.000000e+00> : vector<8x8xf32>
    %41 = tpu.matmul %39, %40, %cst_15 {dimension_numbers = #tpu.dot_dimension_numbers<[1], [1], [0], [0], [0, 0, 1, 0], [], []>} : vector<8x128xbf16>, vector<8x128xbf16>, vector<8x8xf32> -> vector<8x8xf32>
    %42 = arith.addf %41, %9 : vector<8x8xf32>
    %cst_16 = arith.constant dense<0xFF800000> : vector<8xf32>
    %43 = vector.multi_reduction <maximumf>, %42, %cst_16 [1] : vector<8x8xf32> to vector<8xf32>
    %44 = vector.shape_cast %43 : vector<8xf32> to vector<8x1xf32>
    %45 = vector.broadcast %44 : vector<8x1xf32> to vector<8x8xf32>
    %46 = arith.subf %42, %45 : vector<8x8xf32>
    %47 = math.exp %46 : vector<8x8xf32>
    %cst_17 = arith.constant dense<0.000000e+00> : vector<8xf32>
    %48 = vector.multi_reduction <add>, %47, %cst_17 [1] : vector<8x8xf32> to vector<8xf32>
    %49 = vector.shape_cast %48 : vector<8xf32> to vector<8x1xf32>
    %50 = tpu.reciprocal %49 {approx = true} : vector<8x1xf32> -> vector<8x1xf32>
    %51 = vector.broadcast %50 : vector<8x1xf32> to vector<8x8xf32>
    %52 = arith.mulf %47, %51 : vector<8x8xf32>
    %53 = arith.truncf %52 : vector<8x8xf32> to vector<8x8xbf16>
    %54 = arith.truncf %38 : vector<8x128xf32> to vector<8x128xbf16>
    %cst_18 = arith.constant dense<0.000000e+00> : vector<8x128xf32>
    %55 = tpu.matmul %53, %54, %cst_18 {dimension_numbers = #tpu.dot_dimension_numbers<[1], [0], [0], [1], [0, 0, 1, 1], [], []>} : vector<8x8xbf16>, vector<8x128xbf16>, vector<8x128xf32> -> vector<8x128xf32>
    %56 = arith.truncf %55 : vector<8x128xf32> to vector<8x128xbf16>
    %c1 = arith.constant 1 : index
    %c0_19 = arith.constant 0 : index
    %c0_20 = arith.constant 0 : index
    %57 = vector.load %arg3[%c1, %c0_19, %c0_20] : memref<4x128x128xbf16, #tpu.memory_space<vmem>>, vector<1x128x128xbf16>
    %58 = vector.shape_cast %57 : vector<1x128x128xbf16> to vector<128x128xbf16>
    %cst_21 = arith.constant dense<0.000000e+00> : vector<8x128xf32>
    %59 = tpu.matmul %56, %58, %cst_21 {dimension_numbers = #tpu.dot_dimension_numbers<[1], [0], [0], [1], [0, 0, 1, 1], [], []>} : vector<8x128xbf16>, vector<128x128xbf16>, vector<8x128xf32> -> vector<8x128xf32>
    %60 = arith.addf %35, %59 : vector<8x128xf32>
    %61 = vector.extract_strided_slice %3 {offsets = [0, 256], sizes = [8, 128], strides = [1, 1]} : vector<8x1536xf32> to vector<8x128xf32>
    %62 = vector.extract_strided_slice %3 {offsets = [0, 768], sizes = [8, 128], strides = [1, 1]} : vector<8x1536xf32> to vector<8x128xf32>
    %63 = vector.extract_strided_slice %3 {offsets = [0, 1280], sizes = [8, 128], strides = [1, 1]} : vector<8x1536xf32> to vector<8x128xf32>
    %64 = arith.truncf %61 : vector<8x128xf32> to vector<8x128xbf16>
    %65 = arith.truncf %62 : vector<8x128xf32> to vector<8x128xbf16>
    %cst_22 = arith.constant dense<0.000000e+00> : vector<8x8xf32>
    %66 = tpu.matmul %64, %65, %cst_22 {dimension_numbers = #tpu.dot_dimension_numbers<[1], [1], [0], [0], [0, 0, 1, 0], [], []>} : vector<8x128xbf16>, vector<8x128xbf16>, vector<8x8xf32> -> vector<8x8xf32>
    %67 = arith.addf %66, %9 : vector<8x8xf32>
    %cst_23 = arith.constant dense<0xFF800000> : vector<8xf32>
    %68 = vector.multi_reduction <maximumf>, %67, %cst_23 [1] : vector<8x8xf32> to vector<8xf32>
    %69 = vector.shape_cast %68 : vector<8xf32> to vector<8x1xf32>
    %70 = vector.broadcast %69 : vector<8x1xf32> to vector<8x8xf32>
    %71 = arith.subf %67, %70 : vector<8x8xf32>
    %72 = math.exp %71 : vector<8x8xf32>
    %cst_24 = arith.constant dense<0.000000e+00> : vector<8xf32>
    %73 = vector.multi_reduction <add>, %72, %cst_24 [1] : vector<8x8xf32> to vector<8xf32>
    %74 = vector.shape_cast %73 : vector<8xf32> to vector<8x1xf32>
    %75 = tpu.reciprocal %74 {approx = true} : vector<8x1xf32> -> vector<8x1xf32>
    %76 = vector.broadcast %75 : vector<8x1xf32> to vector<8x8xf32>
    %77 = arith.mulf %72, %76 : vector<8x8xf32>
    %78 = arith.truncf %77 : vector<8x8xf32> to vector<8x8xbf16>
    %79 = arith.truncf %63 : vector<8x128xf32> to vector<8x128xbf16>
    %cst_25 = arith.constant dense<0.000000e+00> : vector<8x128xf32>
    %80 = tpu.matmul %78, %79, %cst_25 {dimension_numbers = #tpu.dot_dimension_numbers<[1], [0], [0], [1], [0, 0, 1, 1], [], []>} : vector<8x8xbf16>, vector<8x128xbf16>, vector<8x128xf32> -> vector<8x128xf32>
    %81 = arith.truncf %80 : vector<8x128xf32> to vector<8x128xbf16>
    %c2 = arith.constant 2 : index
    %c0_26 = arith.constant 0 : index
    %c0_27 = arith.constant 0 : index
    %82 = vector.load %arg3[%c2, %c0_26, %c0_27] : memref<4x128x128xbf16, #tpu.memory_space<vmem>>, vector<1x128x128xbf16>
    %83 = vector.shape_cast %82 : vector<1x128x128xbf16> to vector<128x128xbf16>
    %cst_28 = arith.constant dense<0.000000e+00> : vector<8x128xf32>
    %84 = tpu.matmul %81, %83, %cst_28 {dimension_numbers = #tpu.dot_dimension_numbers<[1], [0], [0], [1], [0, 0, 1, 1], [], []>} : vector<8x128xbf16>, vector<128x128xbf16>, vector<8x128xf32> -> vector<8x128xf32>
    %85 = arith.addf %60, %84 : vector<8x128xf32>
    %86 = vector.extract_strided_slice %3 {offsets = [0, 384], sizes = [8, 128], strides = [1, 1]} : vector<8x1536xf32> to vector<8x128xf32>
    %87 = vector.extract_strided_slice %3 {offsets = [0, 896], sizes = [8, 128], strides = [1, 1]} : vector<8x1536xf32> to vector<8x128xf32>
    %88 = vector.extract_strided_slice %3 {offsets = [0, 1408], sizes = [8, 128], strides = [1, 1]} : vector<8x1536xf32> to vector<8x128xf32>
    %89 = arith.truncf %86 : vector<8x128xf32> to vector<8x128xbf16>
    %90 = arith.truncf %87 : vector<8x128xf32> to vector<8x128xbf16>
    %cst_29 = arith.constant dense<0.000000e+00> : vector<8x8xf32>
    %91 = tpu.matmul %89, %90, %cst_29 {dimension_numbers = #tpu.dot_dimension_numbers<[1], [1], [0], [0], [0, 0, 1, 0], [], []>} : vector<8x128xbf16>, vector<8x128xbf16>, vector<8x8xf32> -> vector<8x8xf32>
    %92 = arith.addf %91, %9 : vector<8x8xf32>
    %cst_30 = arith.constant dense<0xFF800000> : vector<8xf32>
    %93 = vector.multi_reduction <maximumf>, %92, %cst_30 [1] : vector<8x8xf32> to vector<8xf32>
    %94 = vector.shape_cast %93 : vector<8xf32> to vector<8x1xf32>
    %95 = vector.broadcast %94 : vector<8x1xf32> to vector<8x8xf32>
    %96 = arith.subf %92, %95 : vector<8x8xf32>
    %97 = math.exp %96 : vector<8x8xf32>
    %cst_31 = arith.constant dense<0.000000e+00> : vector<8xf32>
    %98 = vector.multi_reduction <add>, %97, %cst_31 [1] : vector<8x8xf32> to vector<8xf32>
    %99 = vector.shape_cast %98 : vector<8xf32> to vector<8x1xf32>
    %100 = tpu.reciprocal %99 {approx = true} : vector<8x1xf32> -> vector<8x1xf32>
    %101 = vector.broadcast %100 : vector<8x1xf32> to vector<8x8xf32>
    %102 = arith.mulf %97, %101 : vector<8x8xf32>
    %103 = arith.truncf %102 : vector<8x8xf32> to vector<8x8xbf16>
    %104 = arith.truncf %88 : vector<8x128xf32> to vector<8x128xbf16>
    %cst_32 = arith.constant dense<0.000000e+00> : vector<8x128xf32>
    %105 = tpu.matmul %103, %104, %cst_32 {dimension_numbers = #tpu.dot_dimension_numbers<[1], [0], [0], [1], [0, 0, 1, 1], [], []>} : vector<8x8xbf16>, vector<8x128xbf16>, vector<8x128xf32> -> vector<8x128xf32>
    %106 = arith.truncf %105 : vector<8x128xf32> to vector<8x128xbf16>
    %c3 = arith.constant 3 : index
    %c0_33 = arith.constant 0 : index
    %c0_34 = arith.constant 0 : index
    %107 = vector.load %arg3[%c3, %c0_33, %c0_34] : memref<4x128x128xbf16, #tpu.memory_space<vmem>>, vector<1x128x128xbf16>
    %108 = vector.shape_cast %107 : vector<1x128x128xbf16> to vector<128x128xbf16>
    %cst_35 = arith.constant dense<0.000000e+00> : vector<8x128xf32>
    %109 = tpu.matmul %106, %108, %cst_35 {dimension_numbers = #tpu.dot_dimension_numbers<[1], [0], [0], [1], [0, 0, 1, 1], [], []>} : vector<8x128xbf16>, vector<128x128xbf16>, vector<8x128xf32> -> vector<8x128xf32>
    %110 = arith.addf %85, %109 : vector<8x128xf32>
    %c0_36 = arith.constant 0 : index
    %c0_37 = arith.constant 0 : index
    %111 = vector.load %arg4[%c0_36, %c0_37] : memref<1x128xf32, #tpu.memory_space<vmem>>, vector<1x128xf32>
    %112 = vector.broadcast %111 : vector<1x128xf32> to vector<8x128xf32>
    %113 = arith.addf %110, %112 : vector<8x128xf32>
    %114 = vector.shape_cast %113 : vector<8x128xf32> to vector<1x8x128xf32>
    %c0_38 = arith.constant 0 : index
    %c0_39 = arith.constant 0 : index
    %c0_40 = arith.constant 0 : index
    %115 = vector.load %arg5[%c0_38, %c0_39, %c0_40] : memref<1x8x128xf32, #tpu.memory_space<vmem>>, vector<1x8x128xf32>
    tpu.vector_store %arg5[%c0_38, %c0_39, %c0_40], %114 {strides = array<i32>} : memref<1x8x128xf32, #tpu.memory_space<vmem>>, vector<1x8x128xf32>,
    return
  }
  func.func @transform_0(%arg0: i32) -> (i32, i32, i32) {
    %c0_i32 = arith.constant 0 : i32
    %c0_i32_0 = arith.constant 0 : i32
    %c0_i32_1 = arith.constant 0 : i32
    return %arg0, %c0_i32, %c0_i32_0 : i32, i32, i32
  }
  func.func @transform_1(%arg0: i32) -> (i32, i32) {
    %c0_i32 = arith.constant 0 : i32
    %c0_i32_0 = arith.constant 0 : i32
    %c0_i32_1 = arith.constant 0 : i32
    return %c0_i32, %c0_i32_0 : i32, i32
  }
  func.func @transform_2(%arg0: i32) -> (i32, i32, i32) {
    %c0_i32 = arith.constant 0 : i32
    %c0_i32_0 = arith.constant 0 : i32
    %c0_i32_1 = arith.constant 0 : i32
    %c0_i32_2 = arith.constant 0 : i32
    return %c0_i32, %c0_i32_0, %c0_i32_1 : i32, i32, i32
  }
  func.func @transform_3(%arg0: i32) -> (i32, i32) {
    %c0_i32 = arith.constant 0 : i32
    %c0_i32_0 = arith.constant 0 : i32
    %c0_i32_1 = arith.constant 0 : i32
    return %c0_i32, %c0_i32_0 : i32, i32
  }
  func.func @transform_4(%arg0: i32) -> (i32, i32, i32) {
    %c0_i32 = arith.constant 0 : i32
    %c0_i32_0 = arith.constant 0 : i32
    %c0_i32_1 = arith.constant 0 : i32
    return %arg0, %c0_i32, %c0_i32_0 : i32, i32, i32
  }
}

</mosaic_0001>

<bundles_post_ra>
// kernel: tpu_custom_call.1
= control target key start
LH: loop header
LB: loop body
LE: loop exit
PB: predicated region body
PF: predicated region fallthrough
CT: control target
= control target key end

     0   :  { %9 = vsyncpa [#allocation3], 0  ;;  %s2560_s0 = inlined_call_operand.hbm [shape: bf16[2,8,32], index: 0, kind: input, shape index: {}]   ;;  %s2561_s1 = inlined_call_operand.hbm [shape: bf16[32,1536], index: 1, kind: input, shape index: {}]   ;;  %s2562_s2 = inlined_call_operand.hbm [shape: bf16[4,128,128], index: 2, kind: input, shape index: {}]   ;;  %s2563_s3 = inlined_call_operand.vmem [shape: f32[1,128], index: 3, kind: input, shape index: {}]   ;;  %s2564_s4 = inlined_call_operand.hbm [shape: f32[2,8,128], index: 4, kind: output, shape index: {}]  }
   0x1   :  { %11 = vsyncpa [#allocation3 + $0x1], 0 }
   0x2   :  { %12 = vsyncpa [#allocation6], 0 }
   0x3   :  { %13 = vsyncpa [#allocation4], 0 }
   0x4   :  { %15 = vsyncpa [#allocation4 + $0x1], 0  ;;  %s2204_s15 = smov 0   ;;  %s2206_s16 = smov 0  }
   0x5   :  { %s2208_s17 = smov 0   ;;  %s2210_s18 = smov 0  }
   0x6 LB: > { %s2225_s19 = sadd.s32 4294967295, %s2165_s18   ;;  %s1587_s20 = sadd.s32 4294967294, %s2165_s18   ;;  %s2165_s18 = sphi %s2210_s18, %s2584_s18   ;;  %s2161_s17 = sphi %s2208_s17, %s2583_s17   ;;  %s2157_s16 = sphi %s2206_s16, %s2582_s16   ;;  %s2153_s15 = sphi %s2204_s15, %s2581_s15  }
   0x7   : > { %p41_p0 = scmp.ne.s32.totalorder %s2157_s16, %s2153_s15  ;;  %p2565_p1 = scmp.eq.s32.totalorder %s2225_s19, 0 }
   0x8   : > { %p134_p3 = scmp.eq.s32.totalorder %s1587_s20, 1  ;;  %p1588_p5 = scmp.ge.s32.totalorder %s2165_s18, 1 }
   0x9   : > { %p2234_p4 = por %p2565_p1, %p41_p0  ;;  %p141_p7 = scmp.lt.s32.totalorder %s2165_s18, 3 }
   0xa   : > { %p2239_p6 = por %p134_p3, %p41_p0  ;;  %s2167_s24 = smov [#allocation5]  }
   0xb   : > { %s2568_s21 = scalar_select %p2234_p4, 1, 0 }
   0xc   : > { %s2569_s22 = scalar_select %p2239_p6, 1, 0 }
   0xd   : > { %p2244_p8 = pnand %p1588_p5, %p141_p7  ;;  %s153_s25 = sshll.u32 %s2167_s24, 4  ;;  %s2248_s25 = int_to_ptr.vmem [resolvable:$true] %s153_s25 }
   0xe   : > { %s2168_s27 = smov [#allocation7]   ;;  %s2009_s5 = scalar_lea.hbm %s2561_s1, 3072 }
   0xf   : > { %p1862_p9 = pneg %p2244_p8  ;;  %s166_s28 = sshll.u32 %s2168_s27, 4  ;;  %s2259_s28 = int_to_ptr.vmem [resolvable:$true] %s166_s28 }
  0x10   : > { %p2010_p12 = scmp.ne.s32.totalorder %s2561_s1, %s2009_s5  ;;  %p2016_p5 = scmp.lt.u32.totalorder %s2009_s5, %s2561_s1 }
  0x11   : > { %p2255_p11 = pnand %p1862_p9, %p2565_p1 }
  0x13   : > { %p2011_p13 = pneg %p2255_p11 }
  0x15   : > { %p2012_p0 = pnand %p2011_p13, %p2010_p12 }
  0x17   : > { %p2013_p3 = pneg %p2012_p0 }
  0x19   : > { %p2018_p7 = pnand %p2016_p5, %p2013_p3 }
  0x1b   : > { %2021 = shalt.err (!%p2018_p7)
}
  0x1c   : > { %s2022_s10 = scalar_lea.vmem %s2248_s25, 3072  ;;  %p2030_p2 = scmp.lt.s32.totalorder %s2248_s25, %s2248_s25 }
  0x1d   : > { %p2023_p9 = scmp.ne.s32.totalorder %s2248_s25, %s2022_s10  ;;  %p2031_p12 = scmp.lt.s32.totalorder %s2022_s10, %s2022_s10 }
  0x1f   : > { %p2025_p10 = pnand %p2023_p9, %p2011_p13  ;;  %p2032_p0 = por %p2031_p12, %p2030_p2 }
  0x21   : > { %p2026_p1 = pneg %p2025_p10 }
  0x23   : > { %p2033_p6 = pnand %p2032_p0, %p2026_p1 }
  0x25   : > { %2036 = shalt.err (!%p2033_p6)
}
  0x26   : > { %s2169_s11 = smov 768   ;;  %s2170_s12 = smov 48  }
  0x27   : > { %1865 = dma.hbm_to_vmem [thread:$0]  (!%p2255_p11), %s2561_s1, 3072, %s2248_s25, [#allocation6], %s2169_s11, %s2169_s11, %s2170_s12  }
  0x28   : > { %s2037_s27 = scalar_lea.hbm %s2562_s2, 4096 }
  0x29   : > { %p2038_p2 = scmp.ne.s32.totalorder %s2562_s2, %s2037_s27  ;;  %p2044_p10 = scmp.lt.u32.totalorder %s2037_s27, %s2562_s2 }
  0x2b   : > { %p2040_p1 = pnand %p2038_p2, %p2011_p13 }
  0x2d   : > { %p2041_p6 = pneg %p2040_p1 }
  0x2f   : > { %p2046_p3 = pnand %p2044_p10, %p2041_p6 }
  0x31   : > { %2049 = shalt.err (!%p2046_p3)
}
  0x32   : > { %s2050_s25 = scalar_lea.vmem %s2259_s28, 4096  ;;  %p2058_p12 = scmp.lt.s32.totalorder %s2259_s28, %s2259_s28 }
  0x33   : > { %p2051_p5 = scmp.ne.s32.totalorder %s2259_s28, %s2050_s25  ;;  %p2059_p0 = scmp.lt.s32.totalorder %s2050_s25, %s2050_s25 }
  0x35   : > { %p2053_p7 = pnand %p2051_p5, %p2011_p13  ;;  %p2060_p2 = por %p2059_p0, %p2058_p12 }
  0x37   : > { %p2054_p9 = pneg %p2053_p7 }
  0x39   : > { %p2061_p1 = pnand %p2060_p2, %p2054_p9 }
  0x3b   : > { %2064 = shalt.err (!%p2061_p1)
}
  0x3c   : > { %s2171_s7 = smov 64   ;;  %s2172_s8 = smov 4  }
  0x3d   : > { %1868 = dma.hbm_to_vmem [thread:$0]  (!%p2255_p11), %s2562_s2, 4096, %s2259_s28, [#allocation6], %s2171_s7, %s2171_s7, %s2172_s8  }
  0x3e   : > { %s2314_s11 = sadd.s32 1, %s2165_s18   ;;  %s28_s13 = sadd.s32 1, %s2161_s17 }
  0x3f   : > { %s25_s12 = ssub.s32 %s2165_s18, %s2314_s11  ;;  %p35_p6 = scmp.ne.s32.totalorder %s2161_s17, %s2157_s16 }
  0x40   : > { %p26_p13 = scmp.eq.s32.totalorder %s25_s12, 0  ;;  %p36_p10 = scmp.eq.s32.totalorder %s2165_s18, 0 }
  0x41   : > { %p2572_p5 = scmp.eq.s32.totalorder %s2225_s19, 1  ;;  %p1879_p9 = scmp.lt.s32.totalorder %s2165_s18, 2 }
  0x42   : > { %s2323_s14 = scalar_select %p26_p13, %s2161_s17, %s28_s13  }
  0x43   : > { %p37_p3 = por %p36_p10, %p35_p6  ;;  %p2327_p7 = por %p2572_p5, %p35_p6 }
  0x44   : > { %s183_s26 = sand.u32 1, %s2161_s17   ;;  %s1593_s28 = sshll.u32 %s2165_s18, 6 }
  0x45   : > { %s2573_s20 = scalar_select %p2327_p7, 1, 0 }
  0x46   : > { %s1592_s24 = sshll.u32 %s183_s26, 2  ;;  %s2337_s30 = scalar_lea.hbm %s2560_s0, %s1593_s28 }
  0x47   : > { %s187_s5 = scalar_lea.vmem [#allocation2], %s1592_s24  ;;  %p2341_p11 = pnand %p1879_p9, %p37_p3 }
  0x48   : > { %s194_s6 = sshll.u32 %s187_s5, 4  ;;  %s184_s7 = scalar_lea.sflag [#allocation3], %s183_s26  ;;  %s2339_s6 = int_to_ptr.vmem [resolvable:$true] %s194_s6 }
  0x49   : > { %s2065_s8 = scalar_lea.hbm %s2337_s30, 64  ;;  %p2067_p0 = pneg %p2341_p11 }
  0x4a   : > { %p2066_p12 = scmp.ne.s32.totalorder %s2337_s30, %s2065_s8  ;;  %s2070_s12 = scalar_lea.hbm %s2560_s0, 128 }
  0x4b   : > { %p2071_p13 = scmp.lt.u32.totalorder %s2337_s30, %s2560_s0  ;;  %p2072_p6 = scmp.lt.u32.totalorder %s2070_s12, %s2065_s8 }
  0x4c   : > { %p2068_p2 = pnand %p2067_p0, %p2066_p12  ;;  %p2074_p3 = scmp.lt.u32.totalorder %s2065_s8, %s2337_s30 }
  0x4d   : > { %p2073_p10 = por %p2072_p6, %p2071_p13 }
  0x4e   : > { %p2069_p1 = pneg %p2068_p2 }
  0x4f   : > { %p2075_p5 = por %p2074_p3, %p2073_p10 }
  0x51   : > { %p2076_p9 = pnand %p2075_p5, %p2069_p1 }
  0x53   : > { %2079 = shalt.err (!%p2076_p9)
}
  0x54   : > { %s2080_s26 = scalar_lea.vmem %s2339_s6, 64  ;;  %s2173_s28 = smov [#allocation2]  }
  0x55   : > { %p2081_p12 = scmp.ne.s32.totalorder %s2339_s6, %s2080_s26  ;;  %s2085_s27 = sshll.u32 %s2173_s28, 4  ;;  %s2086_s27 = int_to_ptr.vmem [resolvable:$false] %s2085_s27 }
  0x56   : > { %s2087_s29 = scalar_lea.vmem %s2086_s27, 128  ;;  %p2088_p4 = scmp.lt.s32.totalorder %s2339_s6, %s2086_s27 }
  0x57   : > { %p2083_p2 = pnand %p2081_p12, %p2067_p0  ;;  %p2089_p13 = scmp.lt.s32.totalorder %s2087_s29, %s2080_s26 }
  0x59   : > { %p2084_p7 = pneg %p2083_p2  ;;  %p2090_p6 = por %p2089_p13, %p2088_p4 }
  0x5b   : > { %p2091_p10 = pnand %p2090_p6, %p2084_p7 }
  0x5d   : > { %2094 = shalt.err (!%p2091_p10)
}
  0x5e   : > { %1872 = dma.hbm_to_vmem [thread:$0]  (!%p2341_p11), %s2337_s30, 64, %s2339_s6, %s184_s7  }
  0x5f   : > { %203 = sbr.rel (%p2244_p8) target bundleno = 2625 (0xa41), region = 36  ;;  %s2373_s5 = sand.u32 (!%p2244_p8), 1, %s2157_s16  }
  0x60   : > { %s1595_s8 = sshll.u32 (!%p2244_p8), %s2373_s5, 2  ;;  %s206_s9 = scalar_lea.sflag (!%p2244_p8), [#allocation3], %s2373_s5 }
  0x61   : > { %s209_s10 = scalar_lea.vmem (!%p2244_p8), [#allocation2], %s1595_s8  ;;  %p2575_p4 = scmp.ne.s32.totalorder (!%p2244_p8), %s2568_s21, 0 }
  0x66   : > { %2140 = dma.done.wait (%p2575_p4), %s206_s9, 64  }
  0x67   : > { %2142 = vsyncadd (%p2575_p4), %s206_s9, 4294967232  ;;  %p2576_p7 = scmp.eq.s32.totalorder %s2225_s19, 0 }
  0x69   : > { %2144 = dma.done.wait (%p2576_p7), [#allocation6], 7168   ;;  %p2577_p11 = pmov %p2576_p7 }
  0x6a   : > { %v2174_v0 = vmov 0   ;;  %v1925_v1 = vld [vmem:[#allocation5 + $0x4] ss:$48 sps:$4 sm:$0xff]   ;;  %v1927_v2 = vld [vmem:[#allocation5] ss:$48 sps:$4 sm:$0xff]   ;;  %vm388_vm0 = vcmask 261120   ;;  %v638_v49 = vlaneseq }
  0x6b   : > { %2146 = vsyncadd (%p2577_p11), [#allocation6], 4294960128  ;;  %424 = vmatprep.mubr.bf16.mxu0 %v2174_v0  ;;  %547 = vmatprep.mubr.bf16.mxu1 %v2174_v0  ;;  %v1928_v3 = vld [vmem:[#allocation5 + $0x64] ss:$48 sps:$4 sm:$0xff]   ;;  %v1930_v4 = vld [vmem:[#allocation5 + $0x60] ss:$48 sps:$4 sm:$0xff]  }
  0x6c   : > { %392 = vmatprep.subr.bf16.mxu0 %v1925_v1  ;;  %v1933_v5 = vld [vmem:[#allocation5 + $0xc] ss:$48 sps:$4 sm:$0xff]   ;;  %v1931_v7 = vld [vmem:[#allocation5 + $0x8] ss:$48 sps:$4 sm:$0xff]   ;;  %v1939_v10 = vld [vmem:[#allocation5 + $0x14] ss:$48 sps:$4 sm:$0xff]  }
  0x6d   : > { %393 = vmatpush1.bf16.msra.mxu0 %v1927_v2  ;;  %v243_v6 = vld [vmem:[%s209_s10] sm:$0xf]  ;;  %v1937_v11 = vld [vmem:[#allocation5 + $0x10] ss:$48 sps:$4 sm:$0xff]   ;;  %v1942_v12 = vld [vmem:[#allocation5 + $0x74] ss:$48 sps:$4 sm:$0xff]  }
  0x6e   : > { %394 = vmatprep.subr.bf16.mxu0 %v1928_v3  ;;  %v1936_v8 = vld [vmem:[#allocation5 + $0x6c] ss:$48 sps:$4 sm:$0xff]   ;;  %v1934_v9 = vld [vmem:[#allocation5 + $0x68] ss:$48 sps:$4 sm:$0xff]   ;;  %v1940_v13 = vld [vmem:[#allocation5 + $0x70] ss:$48 sps:$4 sm:$0xff]  }
  0x6f   : > { %v1943_v14 = vld [vmem:[#allocation5 + $0x20] ss:$48 sps:$4 sm:$0xff]   ;;  %v1945_v15 = vld [vmem:[#allocation5 + $0x24] ss:$48 sps:$4 sm:$0xff]   ;;  %v2175_v18 = vmov 0.0   ;;  %vm2176_vm1 = vmmov 0  }
  0x70   : > { %v1948_v16 = vld [vmem:[#allocation5 + $0x84] ss:$48 sps:$4 sm:$0xff]   ;;  %v1946_v17 = vld [vmem:[#allocation5 + $0x80] ss:$48 sps:$4 sm:$0xff]   ;;  %v1949_v19 = vld [vmem:[#allocation5 + $0x1c] ss:$48 sps:$4 sm:$0xff]  }
  0x71   : > { %395 = vmatpush1.bf16.msra.mxu0 %v1930_v4  ;;  %v1951_v20 = vld [vmem:[#allocation5 + $0x18] ss:$48 sps:$4 sm:$0xff]   ;;  %v1952_v21 = vld [vmem:[#allocation5 + $0x7c] ss:$48 sps:$4 sm:$0xff]   ;;  %515 = vmatprep.subr.bf16.mxu1 %v1949_v19  ;;  %vm703_vm2 = vcmask 1043456   ;;  %v639_v50 = vshrl.u32 %v638_v49, 7 }
  0x72   : > { %433 = vmatprep.subr.bf16.mxu0 %v1933_v5  ;;  %516 = vmatpush1.bf16.msra.mxu1 %v1951_v20  ;;  %v1954_v22 = vld [vmem:[#allocation5 + $0x78] ss:$48 sps:$4 sm:$0xff]   ;;  %v1957_v23 = vld [vmem:[#allocation5 + $0x2c] ss:$48 sps:$4 sm:$0xff]   ;;  %v641_v51 = vand.u32 127, %v638_v49  ;;  %vm686_vm4 = vcmask 64512  }
  0x73   : > { %517 = vmatprep.subr.bf16.mxu1 %v1952_v21  ;;  %v1955_v24 = vld [vmem:[#allocation5 + $0x28] ss:$48 sps:$4 sm:$0xff]   ;;  %v1960_v26 = vld [vmem:[#allocation5 + $0x8c] ss:$48 sps:$4 sm:$0xff]   ;;  %v2177_v52 = vmov -1e+30  }
  0x74   : > { %1623 = vmatmul.mubr.msk.bf16.vlgmr.msra.gmra.mrb[0].mxu0 %vm388_vm0, %v243_v6  ;;  %v1958_v25 = vld [vmem:[#allocation5 + $0x88] ss:$48 sps:$4 sm:$0xff]   ;;  %vm642_vm3 = vcmp.le.s32.totalorder %v641_v51, %v639_v50  ;;  %s1598_s21 = sshll.u32 %s2373_s5, 3  ;;  %s1667_s6 = sshll.u32 %s2225_s19, 7 }
  0x75   : > { %434 = vmatpush1.bf16.msra.mxu0 %v1931_v7  ;;  %465 = vmatprep.mubr.bf16.mxu0 %v2174_v0  ;;  %v2411_v53 = vsel %vm642_vm3, 0.0, %v2177_v52  ;;  %v1968_v20 = vld [vmem:[#allocation7 + $0x58] sm:$0xff]   ;;  %s241_s25 = scalar_lea.vmem [#allocation8], %s1598_s21  ;;  %s2516_s24 = scalar_lea.hbm %s2564_s4, %s1667_s6 }
  0x76   : > { %435 = vmatprep.subr.bf16.mxu0 %v1936_v8  ;;  %518 = vmatpush1.bf16.msra.mxu1 %v1954_v22  ;;  %v1970_v22 = vld [vmem:[#allocation7 + $0x60] sm:$0xff]   ;;  %s1498_s7 = sshll.u32 %s241_s25, 4  ;;  %s1485_s26 = scalar_lea.sflag [#allocation4], %s2373_s5  ;;  %s2518_s7 = int_to_ptr.vmem [resolvable:$true] %s1498_s7 }
  0x77   : > { %597 = vmatprep.subr.bf16.mxu1 %v1957_v23  ;;  %s2095_s19 = scalar_lea.vmem %s2518_s7, 128  ;;  %p2578_p0 = scmp.ne.s32.totalorder %s2573_s20, 0 }
  0x78   : > { %p2096_p8 = scmp.ne.s32.totalorder %s2518_s7, %s2095_s19  ;;  %s2178_s28 = smov [#allocation8]  }
  0x79   : > { %436 = vmatpush1.bf16.msra.mxu0 %v1934_v9  ;;  %1626 = vmatmul.mubr.msk.bf16.vlgmr.msra.gmra.mrb[0].mxu1 %vm388_vm0, %v243_v6  ;;  %s2099_s27 = sshll.u32 %s2178_s28, 4  ;;  %s2100_s27 = int_to_ptr.vmem [resolvable:$false] %s2099_s27 }
  0x7a   : > { %474 = vmatprep.subr.bf16.mxu0 %v1939_v10  ;;  %598 = vmatpush1.bf16.msra.mxu1 %v1955_v24  ;;  %p2097_p1 = pnand %p2096_p8, %p2578_p0  ;;  %s2101_s29 = scalar_lea.vmem %s2100_s27, 256 }
  0x7b   : > { %629 = vmatprep.mubr.bf16.mxu1 %v2174_v0  ;;  %599 = vmatprep.subr.bf16.mxu1 %v1960_v26  ;;  %v1972_v26 = vld [vmem:[#allocation7 + $0x68] sm:$0xff]   ;;  %p2102_p5 = scmp.lt.s32.totalorder %s2518_s7, %s2100_s27  ;;  %p2103_p9 = scmp.lt.s32.totalorder %s2101_s29, %s2095_s19 }
  0x7c   : > { %1624 = vmatmul.mubr.msk.bf16.vlgmr.msra.gmra.mrb[4].mxu0 %vm388_vm0, %v243_v6  ;;  %p2098_p3 = pneg %p2097_p1 }
  0x7d   : > { %475 = vmatpush1.bf16.msra.mxu0 %v1937_v11  ;;  %506 = vmatprep.mubr.bf16.mxu0 %v2174_v0  ;;  %p2104_p12 = por %p2103_p9, %p2102_p5 }
  0x7e   : > { %476 = vmatprep.subr.bf16.mxu0 %v1942_v12  ;;  %600 = vmatpush1.bf16.msra.mxu1 %v1958_v25  ;;  %v1962_v12 = vld [vmem:[#allocation7 + $0x40] sm:$0xff]  }
  0x7f   : > { %1728 = vmatprep.subr.bf16.mxu1 %v2175_v18  ;;  %p2105_p2 = pnand %p2104_p12, %p2098_p3 }
  0x81   : > { %477 = vmatpush1.bf16.msra.mxu0 %v1940_v13  ;;  %1628 = vmatmul.mubr.msk.bf16.vlgmr.msra.gmra.mrb[4].mxu1 %vm388_vm0, %v243_v6  ;;  %v1964_v13 = vld [vmem:[#allocation7 + $0x48] sm:$0xff]  }
  0x82   : > { %556 = vmatprep.subr.bf16.mxu0 %v1945_v15  ;;  %1730 = vmatprep.mubr.msk.bf16.mxu1 %vm2176_vm1, %v2175_v18  ;;  %v1966_v15 = vld [vmem:[#allocation7 + $0x50] sm:$0xff]  }
  0x84   : > { %1625 = vmatmul.mubr.msk.bf16.vlgmr.msra.gmra.mrb[8].mxu0 %vm388_vm0, %v243_v6 }
  0x85   : > { %588 = vmatprep.mubr.bf16.mxu0 %v2174_v0  ;;  %557 = vmatpush1.bf16.msra.mxu0 %v1943_v14 }
  0x86   : > { %558 = vmatprep.subr.bf16.mxu0 %v1948_v16 }
  0x89   : > { %559 = vmatpush1.bf16.msra.mxu0 %v1946_v17 }
  0x8a   : > { %1722 = vmatprep.subr.bf16.mxu0 %v2175_v18 }
  0x8c   : > { %1627 = vmatmul.mubr.msk.bf16.vlgmr.msra.gmra.mrb[12].mxu0 %vm388_vm0, %v243_v6 }
  0x8d   : > { %1724 = vmatprep.mubr.msk.bf16.mxu0 %vm2176_vm1, %v2175_v18 }
 0x147   : > { %v426_v27 = vpop.f32.mrb[0].mxu0 }
 0x148   : > { %v428_v28 = vpop.f32.mrb[1].mxu0  ;;  %v644_v40 = vpack.c.bf16 %v426_v27, %v426_v27  ;;  %v1974_v27 = vld [vmem:[#allocation7 + $0x70] sm:$0xff]  }
 0x149   : > { %v430_v29 = vpop.f32.mrb[2].mxu0  ;;  %v764_v42 = vpack.c.bf16 %v428_v28, %v428_v28 }
 0x14a   : > { %v431_v30 = vpop.f32.mrb[3].mxu0 }
 0x14c   : > { %v2421_v14 = vpop.f32.mrb[0].mxu1 }
 0x14d   : > { %v2423_v16 = vpop.f32.mrb[1].mxu1 }
 0x14e   : > { %v553_v17 = vpop.f32.mrb[2].mxu1 }
 0x14f   : > { %v2397_v31 = vpop.f32.mrb[4].mxu0  ;;  %v554_v19 = vpop.f32.mrb[3].mxu1 }
 0x150   : > { %v2399_v32 = vpop.f32.mrb[5].mxu0 }
 0x151   : > { %v471_v33 = vpop.f32.mrb[6].mxu0 }
 0x152   : > { %v472_v34 = vpop.f32.mrb[7].mxu0 }
 0x154   : > { %v2427_v21 = vpop.f32.mrb[4].mxu1 }
 0x155   : > { %v2429_v23 = vpop.f32.mrb[5].mxu1  ;;  %v1113_v49 = vpack.c.bf16 %v2427_v21, %v2427_v21  ;;  %v1977_v21 = vld [vmem:[#allocation7 + $0x80] sm:$0xff]  }
 0x156   : > { %v635_v24 = vpop.f32.mrb[6].mxu1 }
 0x157   : > { %v508_v35 = vpop.f32.mrb[8].mxu0  ;;  %v636_v25 = vpop.f32.mrb[7].mxu1  ;;  %v1979_v24 = vld [vmem:[#allocation7 + $0x90] sm:$0xff]  }
 0x158   : > { %v645_v36 = vpack.c.bf16 %v508_v35, %v508_v35  ;;  %v510_v37 = vpop.f32.mrb[9].mxu0  ;;  %v1980_v25 = vld [vmem:[#allocation7 + $0x98] sm:$0xff]  }
 0x159   : > { %v512_v38 = vpop.f32.mrb[10].mxu0  ;;  %v765_v41 = vpack.c.bf16 %v510_v37, %v510_v37 }
 0x15a   : > { %v513_v39 = vpop.f32.mrb[11].mxu0  ;;  %1723 = vmatpush3.bf16.xpose.msra.mxu0 %v645_v36 }
 0x15b   : > { %1734 = vmatprep.subr.bf16.mxu0 %v2175_v18  ;;  %v1961_v39 = vld [vmem:[#allocation7] sm:$0xff]  }
 0x15f   : > { %v590_v43 = vpop.f32.mrb[12].mxu0 }
 0x160   : > { %v699_v44 = vpack.c.bf16 %v590_v43, %v590_v43  ;;  %v2407_v45 = vpop.f32.mrb[13].mxu0  ;;  %v1967_v43 = vld [vmem:[#allocation7 + $0x18] sm:$0xff]  }
 0x161   : > { %1725 = vmatmul.mubr.bf16.vlgmr.msra.gmra.mrb[16].mxu0 %v644_v40  ;;  %v594_v46 = vpop.f32.mrb[14].mxu0  ;;  %v818_v33 = vpack.c.bf16 %v2407_v45, %v2407_v45  ;;  %v1971_v45 = vld [vmem:[#allocation7 + $0x28] sm:$0xff]  }
 0x162   : > { %1735 = vmatpush3.bf16.xpose.msra.mxu0 %v765_v41  ;;  %1736 = vmatprep.mubr.msk.bf16.mxu0 %vm2176_vm1, %v2175_v18  ;;  %v705_v47 = vsel %vm703_vm2, %v699_v44, 0  ;;  %v595_v48 = vpop.f32.mrb[15].mxu0  ;;  %v1963_v41 = vld [vmem:[#allocation7 + $0x8] sm:$0xff]   ;;  %v1969_v44 = vld [vmem:[#allocation7 + $0x20] sm:$0xff]   ;;  %v1973_v46 = vld [vmem:[#allocation7 + $0x30] sm:$0xff]  }
 0x163   : > { %1746 = vmatprep.subr.bf16.mxu0 %v2175_v18  ;;  %1729 = vmatpush3.bf16.msra.mxu1 %v705_v47  ;;  %v823_v36 = vsel %vm703_vm2, %v818_v33, 0  ;;  %v1975_v47 = vld [vmem:[#allocation7 + $0x38] sm:$0xff]  }
 0x164   : > { %1740 = vmatprep.subr.bf16.mxu1 %v2175_v18  ;;  %v1976_v48 = vld [vmem:[#allocation7 + $0x78] sm:$0xff]  }
 0x169   : > { %1737 = vmatmul.mubr.bf16.vlgmr.msra.gmra.mrb[20].mxu0 %v764_v42  ;;  %v1965_v42 = vld [vmem:[#allocation7 + $0x10] sm:$0xff]  }
 0x16a   : > { %1762 = vmatprep.mubr.msk.bf16.mxu0 %vm2176_vm1, %v2175_v18  ;;  %1747 = vmatpush3.bf16.msra.mxu0 %v1962_v12 }
 0x16b   : > { %1748 = vmatprep.subr.bf16.mxu0 %v2175_v18 }
 0x16e   : > { %1749 = vmatpush3.bf16.msra.mxu0 %v1964_v13 }
 0x16f   : > { %1750 = vmatprep.subr.bf16.mxu0 %v2175_v18 }
 0x172   : > { %1751 = vmatpush3.bf16.msra.mxu0 %v1966_v15 }
 0x173   : > { %1752 = vmatprep.subr.bf16.mxu0 %v2175_v18 }
 0x176   : > { %1753 = vmatpush3.bf16.msra.mxu0 %v1968_v20 }
 0x177   : > { %1754 = vmatprep.subr.bf16.mxu0 %v2175_v18 }
 0x17a   : > { %1755 = vmatpush3.bf16.msra.mxu0 %v1970_v22  ;;  %v1978_v22 = vld [vmem:[#allocation7 + $0x88] sm:$0xff]  }
 0x17b   : > { %1756 = vmatprep.subr.bf16.mxu0 %v2175_v18 }
 0x17e   : > { %1757 = vmatpush3.bf16.msra.mxu0 %v1972_v26  ;;  %v1981_v26 = vld [vmem:[#allocation7 + $0xa0] sm:$0xff]  }
 0x17f   : > { %1758 = vmatprep.subr.bf16.mxu0 %v2175_v18 }
 0x182   : > { %1759 = vmatpush3.bf16.msra.mxu0 %v1974_v27  ;;  %v1982_v27 = vld [vmem:[#allocation7 + $0xa8] sm:$0xff]  }
 0x183   : > { %1760 = vmatprep.subr.bf16.mxu0 %v2175_v18 }
 0x186   : > { %1761 = vmatpush3.bf16.msra.mxu0 %v1976_v48 }
 0x187   : > { %1786 = vmatprep.subr.bf16.mxu0 %v2175_v18 }
 0x234   : > { %v680_v54 = vpop.f32.mrb[16].mxu0 }
 0x235   : > { %v681_v55 = vadd.f32 %v680_v54, %v2411_v53  ;;  %v1726_v56 = vpop.f32.mrb[17].mxu0 }
 0x236   : > { %v683_v57 = vpop.f32.mrb[18].mxu0 }
 0x237   : > { %v1727_v58 = vpop.f32.mrb[19].mxu0  ;;  %v687_v59 = vsel %vm686_vm4, %v681_v55, -inf }
 0x238   : > { %688 = vmax.xlane.f32.xlu0 %v687_v59 }
 0x23c   : > { %v800_v60 = vpop.f32.mrb[20].mxu0 }
 0x23d   : > { %v801_v61 = vadd.f32 %v800_v60, %v2411_v53  ;;  %v1738_v62 = vpop.f32.mrb[21].mxu0  ;;  %v1060_v60 = vpack.c.bf16 %v2421_v14, %v2421_v14 }
 0x23e   : > { %v803_v63 = vpop.f32.mrb[22].mxu0 }
 0x23f   : > { %v1739_v0 = vpop.f32.mrb[23].mxu0  ;;  %v806_v1 = vsel %vm686_vm4, %v801_v61, -inf  ;;  %v1059_v63 = vpack.c.bf16 %v2397_v31, %v2397_v31 }
 0x240   : > { %807 = vmax.xlane.f32.xlu0 %v806_v1 }
 0x2c5   : > { %v689_v2 = vpop.xlane.xlu0 %688 }
 0x2c6   : > { %v690_v3 = vsub.f32 %v681_v55, %v689_v2  ;;  %v1118_v55 = vsel %vm703_vm2, %v1113_v49, 0 }
 0x2c8   : > { %v691_v4 = vmul.f32 1.442695, %v690_v3 }
 0x2ca   : > { %1993 = vpow2.f32 %v691_v4 }
 0x2cd   : > { %v808_v5 = vpop.xlane.xlu0 %807 }
 0x2ce   : > { %v809_v6 = vsub.f32 %v801_v61, %v808_v5 }
 0x2d0   : > { %v810_v7 = vmul.f32 1.442695, %v809_v6 }
 0x2d2   : > { %1995 = vpow2.f32 %v810_v7 }
 0x2d4   : > { %v1994_v8 = vpop.eup %1993 }
 0x2d5   : > { %v693_v9 = vsel %vm686_vm4, %v1994_v8, 0.0 }
 0x2d6   : > { %694 = vadd.xlane.f32.xlu1 %v693_v9 }
 0x2dc   : > { %v1996_v10 = vpop.eup %1995 }
 0x2dd   : > { %v812_v11 = vsel %vm686_vm4, %v1996_v10, 0.0 }
 0x2de   : > { %813 = vadd.xlane.f32.xlu1 %v812_v11 }
 0x363   : > { %v695_v28 = vpop.xlane.xlu1 %694 }
 0x364   : > { %1997 = vrcp.f32 %v695_v28  ;;  %v1983_v28 = vld [vmem:[#allocation7 + $0xb0] sm:$0xff]  }
 0x36b   : > { %v814_v29 = vpop.xlane.xlu1 %813 }
 0x36c   : > { %1999 = vrcp.f32 %v814_v29 }
 0x36e   : > { %v1998_v30 = vpop.eup %1997 }
 0x36f   : > { %v697_v34 = vmul.f32 %v1998_v30, %v1994_v8 }
 0x371   : > { %v698_v35 = vpack.c.bf16 %v697_v34, %v697_v34 }
 0x373   : > { %1731 = vmatmul.mubr.msk.bf16.vlgmr.msra.gmra.mrb[8].mxu1 %vm686_vm4, %v698_v35  ;;  %v1268_v35 = vpack.c.bf16 %v2423_v16, %v2423_v16  ;;  %v1984_v16 = vld [vmem:[#allocation7 + $0xb8] sm:$0xff]  }
 0x374   : > { %1741 = vmatpush3.bf16.msra.mxu1 %v823_v36  ;;  %1742 = vmatprep.mubr.msk.bf16.mxu1 %vm2176_vm1, %v2175_v18  ;;  %v1321_v36 = vpack.c.bf16 %v2429_v23, %v2429_v23 }
 0x375   : > { %1766 = vmatprep.subr.bf16.mxu1 %v2175_v18 }
 0x376   : > { %v2000_v37 = vpop.eup %1999 }
 0x377   : > { %v816_v38 = vmul.f32 %v2000_v37, %v1996_v10  ;;  %v1267_v37 = vpack.c.bf16 %v2399_v32, %v2399_v32 }
 0x379   : > { %v817_v40 = vpack.c.bf16 %v816_v38, %v816_v38  ;;  %v1326_v38 = vsel %vm703_vm2, %v1321_v36, 0 }
 0x37b   : > { %1743 = vmatmul.mubr.msk.bf16.vlgmr.msra.gmra.mrb[12].mxu1 %vm686_vm4, %v817_v40 }
 0x37c   : > { %1767 = vmatpush3.bf16.msra.mxu1 %v1961_v39  ;;  %1782 = vmatprep.mubr.msk.bf16.mxu1 %vm2176_vm1, %v2175_v18 }
 0x37d   : > { %1768 = vmatprep.subr.bf16.mxu1 %v2175_v18 }
 0x380   : > { %1769 = vmatpush3.bf16.msra.mxu1 %v1963_v41 }
 0x381   : > { %1770 = vmatprep.subr.bf16.mxu1 %v2175_v18 }
 0x384   : > { %1771 = vmatpush3.bf16.msra.mxu1 %v1965_v42 }
 0x385   : > { %1772 = vmatprep.subr.bf16.mxu1 %v2175_v18 }
 0x388   : > { %1773 = vmatpush3.bf16.msra.mxu1 %v1967_v43 }
 0x389   : > { %1774 = vmatprep.subr.bf16.mxu1 %v2175_v18 }
 0x38c   : > { %1775 = vmatpush3.bf16.msra.mxu1 %v1969_v44 }
 0x38d   : > { %1776 = vmatprep.subr.bf16.mxu1 %v2175_v18 }
 0x390   : > { %1777 = vmatpush3.bf16.msra.mxu1 %v1971_v45 }
 0x391   : > { %1778 = vmatprep.subr.bf16.mxu1 %v2175_v18 }
 0x394   : > { %1779 = vmatpush3.bf16.msra.mxu1 %v1973_v46 }
 0x395   : > { %1780 = vmatprep.subr.bf16.mxu1 %v2175_v18 }
 0x398   : > { %1781 = vmatpush3.bf16.msra.mxu1 %v1975_v47 }
 0x399   : > { %1792 = vmatprep.subr.bf16.mxu1 %v2175_v18 }
 0x446   : > { %v741_v50 = vpop.f32.mrb[8].mxu1 }
 0x447   : > { %v747_v51 = vpack.c.bf16 %v741_v50, %v741_v50  ;;  %v1732_v52 = vpop.f32.mrb[9].mxu1 }
 0x448   : > { %v744_v54 = vpop.f32.mrb[10].mxu1 }
 0x449   : > { %v1733_v56 = vpop.f32.mrb[11].mxu1  ;;  %1783 = vmatmul.mubr.bf16.vlgmr.msra.gmra.mrb[16].mxu1 %v747_v51 }
 0x44a   : > { %1793 = vmatpush3.bf16.msra.mxu1 %v1118_v55  ;;  %1794 = vmatprep.mubr.msk.bf16.mxu1 %vm2176_vm1, %v2175_v18 }
 0x44b   : > { %1818 = vmatprep.subr.bf16.mxu1 %v2175_v18 }
 0x44e   : > { %v859_v57 = vpop.f32.mrb[12].mxu1 }
 0x44f   : > { %v865_v58 = vpack.c.bf16 %v859_v57, %v859_v57  ;;  %v1744_v59 = vpop.f32.mrb[13].mxu1 }
 0x450   : > { %v862_v61 = vpop.f32.mrb[14].mxu1 }
 0x451   : > { %v1745_v62 = vpop.f32.mrb[15].mxu1  ;;  %1763 = vmatmul.mubr.bf16.vlgmr.msra.gmra.mrb[24].mxu0 %v865_v58  ;;  %v1985_v61 = vld [vmem:[#allocation7 + $0xc0] sm:$0xff]  }
 0x452   : > { %1787 = vmatpush3.bf16.xpose.msra.mxu0 %v1060_v60  ;;  %1788 = vmatprep.mubr.msk.bf16.mxu0 %vm2176_vm1, %v2175_v18 }
 0x453   : > { %1798 = vmatprep.subr.bf16.mxu0 %v2175_v18 }
 0x459   : > { %1789 = vmatmul.mubr.bf16.vlgmr.msra.gmra.mrb[28].mxu0 %v1059_v63  ;;  %v1986_v63 = vld [vmem:[#allocation7 + $0xc8] sm:$0xff]  }
 0x45a   : > { %1814 = vmatprep.mubr.msk.bf16.mxu0 %vm2176_vm1, %v2175_v18  ;;  %1799 = vmatpush3.bf16.msra.mxu0 %v1977_v21 }
 0x45b   : > { %1800 = vmatprep.subr.bf16.mxu0 %v2175_v18 }
 0x45e   : > { %1801 = vmatpush3.bf16.msra.mxu0 %v1978_v22 }
 0x45f   : > { %1802 = vmatprep.subr.bf16.mxu0 %v2175_v18 }
 0x462   : > { %1803 = vmatpush3.bf16.msra.mxu0 %v1979_v24 }
 0x463   : > { %1804 = vmatprep.subr.bf16.mxu0 %v2175_v18 }
 0x466   : > { %1805 = vmatpush3.bf16.msra.mxu0 %v1980_v25 }
 0x467   : > { %1806 = vmatprep.subr.bf16.mxu0 %v2175_v18 }
 0x46a   : > { %1807 = vmatpush3.bf16.msra.mxu0 %v1981_v26 }
 0x46b   : > { %1808 = vmatprep.subr.bf16.mxu0 %v2175_v18 }
 0x46e   : > { %1809 = vmatpush3.bf16.msra.mxu0 %v1982_v27 }
 0x46f   : > { %1810 = vmatprep.subr.bf16.mxu0 %v2175_v18 }
 0x472   : > { %1811 = vmatpush3.bf16.msra.mxu0 %v1983_v28 }
 0x473   : > { %1812 = vmatprep.subr.bf16.mxu0 %v2175_v18 }
 0x476   : > { %1813 = vmatpush3.bf16.msra.mxu0 %v1984_v16 }
 0x51c   : > { %v1053_v0 = vpop.f32.mrb[16].mxu1 }
 0x51d   : > { %v1784_v1 = vpop.f32.mrb[17].mxu1 }
 0x51e   : > { %v1056_v2 = vpop.f32.mrb[18].mxu1  ;;  %v1988_v1 = vld [vmem:[#allocation7 + $0xd8] sm:$0xff]  }
 0x51f   : > { %v1785_v3 = vpop.f32.mrb[19].mxu1  ;;  %v1989_v2 = vld [vmem:[#allocation7 + $0xe0] sm:$0xff]  }
 0x520   : > { %v1990_v3 = vld [vmem:[#allocation7 + $0xe8] sm:$0xff]  }
 0x524   : > { %v965_v4 = vpop.f32.mrb[24].mxu0 }
 0x525   : > { %v2468_v5 = vadd.f32 %v1053_v0, %v965_v4  ;;  %v1764_v6 = vpop.f32.mrb[25].mxu0  ;;  %v1987_v0 = vld [vmem:[#allocation7 + $0xd0] sm:$0xff]  }
 0x526   : > { %v968_v7 = vpop.f32.mrb[26].mxu0  ;;  %v1991_v4 = vld [vmem:[#allocation7 + $0xf0] sm:$0xff]  }
 0x527   : > { %v1765_v8 = vpop.f32.mrb[27].mxu0 }
 0x52c   : > { %v1095_v9 = vpop.f32.mrb[28].mxu0 }
 0x52d   : > { %v1096_v10 = vadd.f32 %v1095_v9, %v2411_v53  ;;  %v1790_v11 = vpop.f32.mrb[29].mxu0 }
 0x52e   : > { %v1098_v12 = vpop.f32.mrb[30].mxu0 }
 0x52f   : > { %v1791_v31 = vpop.f32.mrb[31].mxu0  ;;  %v1101_v13 = vsel %vm686_vm4, %v1096_v10, -inf  ;;  %v1665_v12 = vld [vmem:[%s2563_s3] ss:$0 sm:$0xff] }
 0x530   : > { %1102 = vmax.xlane.f32.xlu0 %v1101_v13 }
 0x5bd   : > { %v1103_v14 = vpop.xlane.xlu0 %1102 }
 0x5be   : > { %v1104_v15 = vsub.f32 %v1096_v10, %v1103_v14 }
 0x5c0   : > { %v1105_v17 = vmul.f32 1.442695, %v1104_v15 }
 0x5c2   : > { %2001 = vpow2.f32 %v1105_v17 }
 0x5cc   : > { %v2002_v19 = vpop.eup %2001 }
 0x5cd   : > { %v1107_v20 = vsel %vm686_vm4, %v2002_v19, 0.0 }
 0x5ce   : > { %1108 = vadd.xlane.f32.xlu1 %v1107_v20 }
 0x65b   : > { %v1109_v29 = vpop.xlane.xlu1 %1108 }
 0x65c   : > { %2003 = vrcp.f32 %v1109_v29 }
 0x666   : > { %v2004_v30 = vpop.eup %2003 }
 0x667   : > { %v1111_v33 = vmul.f32 %v2004_v30, %v2002_v19 }
 0x669   : > { %v1112_v34 = vpack.c.bf16 %v1111_v33, %v1111_v33 }
 0x66b   : > { %1795 = vmatmul.mubr.msk.bf16.vlgmr.msra.gmra.mrb[20].mxu1 %vm686_vm4, %v1112_v34 }
 0x66c   : > { %1819 = vmatpush3.bf16.xpose.msra.mxu1 %v1268_v35  ;;  %1820 = vmatprep.mubr.msk.bf16.mxu1 %vm2176_vm1, %v2175_v18 }
 0x66d   : > { %1824 = vmatprep.subr.bf16.mxu1 %v2175_v18 }
 0x673   : > { %1821 = vmatmul.mubr.bf16.vlgmr.msra.gmra.mrb[24].mxu1 %v1267_v37 }
 0x674   : > { %1825 = vmatpush3.bf16.msra.mxu1 %v1326_v38  ;;  %1826 = vmatprep.mubr.msk.bf16.mxu1 %vm2176_vm1, %v2175_v18 }
 0x675   : > { %1830 = vmatprep.subr.bf16.mxu1 %v2175_v18 }
 0x73e   : > { %v1154_v39 = vpop.f32.mrb[20].mxu1 }
 0x73f   : > { %v1160_v40 = vpack.c.bf16 %v1154_v39, %v1154_v39  ;;  %v1796_v41 = vpop.f32.mrb[21].mxu1 }
 0x740   : > { %v1157_v42 = vpop.f32.mrb[22].mxu1 }
 0x741   : > { %v1797_v43 = vpop.f32.mrb[23].mxu1  ;;  %1815 = vmatmul.mubr.bf16.vlgmr.msra.gmra.mrb[32].mxu0 %v1160_v40 }
 0x746   : > { %v1303_v23 = vpop.f32.mrb[24].mxu1 }
 0x747   : > { %v1304_v32 = vadd.f32 %v1303_v23, %v2411_v53  ;;  %v1822_v44 = vpop.f32.mrb[25].mxu1 }
 0x748   : > { %v1306_v45 = vpop.f32.mrb[26].mxu1 }
 0x749   : > { %v1823_v46 = vpop.f32.mrb[27].mxu1  ;;  %v1309_v47 = vsel %vm686_vm4, %v1304_v32, -inf }
 0x74a   : > { %1310 = vmax.xlane.f32.xlu0 %v1309_v47 }
 0x7d7   : > { %v1311_v48 = vpop.xlane.xlu0 %1310 }
 0x7d8   : > { %v1312_v49 = vsub.f32 %v1304_v32, %v1311_v48 }
 0x7da   : > { %v1313_v50 = vmul.f32 1.442695, %v1312_v49 }
 0x7dc   : > { %2005 = vpow2.f32 %v1313_v50 }
 0x7e6   : > { %v2006_v51 = vpop.eup %2005 }
 0x7e7   : > { %v1315_v52 = vsel %vm686_vm4, %v2006_v51, 0.0 }
 0x7e8   : > { %1316 = vadd.xlane.f32.xlu1 %v1315_v52 }
 0x814   : > { %v1260_v54 = vpop.f32.mrb[32].mxu0 }
 0x815   : > { %v1266_v55 = vadd.f32 %v1260_v54, %v2468_v5  ;;  %v1816_v56 = vpop.f32.mrb[33].mxu0  ;;  %v1992_v5 = vld [vmem:[#allocation7 + $0xf8] sm:$0xff]  }
 0x816   : > { %v1263_v57 = vpop.f32.mrb[34].mxu0 }
 0x817   : > { %v1817_v53 = vpop.f32.mrb[35].mxu0 }
 0x875   : > { %v1317_v58 = vpop.xlane.xlu1 %1316 }
 0x876   : > { %2007 = vrcp.f32 %v1317_v58 }
 0x880   : > { %v2008_v59 = vpop.eup %2007 }
 0x881   : > { %v1319_v60 = vmul.f32 %v2008_v59, %v2006_v51 }
 0x883   : > { %v1320_v62 = vpack.c.bf16 %v1319_v60, %v1319_v60 }
 0x885   : > { %1827 = vmatmul.mubr.msk.bf16.vlgmr.msra.gmra.mrb[28].mxu1 %vm686_vm4, %v1320_v62 }
 0x886   : > { %1831 = vmatpush3.bf16.msra.mxu1 %v1985_v61  ;;  %1846 = vmatprep.mubr.msk.bf16.mxu1 %vm2176_vm1, %v2175_v18 }
 0x887   : > { %1832 = vmatprep.subr.bf16.mxu1 %v2175_v18 }
 0x88a   : > { %1833 = vmatpush3.bf16.msra.mxu1 %v1986_v63 }
 0x88b   : > { %1834 = vmatprep.subr.bf16.mxu1 %v2175_v18 }
 0x88e   : > { %1835 = vmatpush3.bf16.msra.mxu1 %v1987_v0 }
 0x88f   : > { %1836 = vmatprep.subr.bf16.mxu1 %v2175_v18 }
 0x892   : > { %1837 = vmatpush3.bf16.msra.mxu1 %v1988_v1 }
 0x893   : > { %1838 = vmatprep.subr.bf16.mxu1 %v2175_v18 }
 0x896   : > { %1839 = vmatpush3.bf16.msra.mxu1 %v1989_v2 }
 0x897   : > { %1840 = vmatprep.subr.bf16.mxu1 %v2175_v18 }
 0x89a   : > { %1841 = vmatpush3.bf16.msra.mxu1 %v1990_v3 }
 0x89b   : > { %1842 = vmatprep.subr.bf16.mxu1 %v2175_v18 }
 0x89e   : > { %1843 = vmatpush3.bf16.msra.mxu1 %v1991_v4 }
 0x89f   : > { %1844 = vmatprep.subr.bf16.mxu1 %v2175_v18 }
 0x8a2   : > { %1845 = vmatpush3.bf16.msra.mxu1 %v1992_v5 }
 0x958   : > { %v1362_v6 = vpop.f32.mrb[28].mxu1 }
 0x959   : > { %v1368_v7 = vpack.c.bf16 %v1362_v6, %v1362_v6  ;;  %v1828_v8 = vpop.f32.mrb[29].mxu1 }
 0x95a   : > { %v1365_v9 = vpop.f32.mrb[30].mxu1 }
 0x95b   : > { %v1829_v10 = vpop.f32.mrb[31].mxu1  ;;  %1847 = vmatmul.mubr.bf16.vlgmr.msra.gmra.mrb[32].mxu1 %v1368_v7 }
 0xa2e   : > { %v1468_v11 = vpop.f32.mrb[32].mxu1 }
 0xa2f   : > { %v1474_v18 = vadd.f32 %v1468_v11, %v1266_v55  ;;  %v1848_v31 = vpop.f32.mrb[33].mxu1 }
 0xa30   : > { %v1471_v13 = vpop.f32.mrb[34].mxu1 }
 0xa31   : > { %v1482_v14 = vadd.f32 %v1665_v12, %v1474_v18  ;;  %v1849_v15 = vpop.f32.mrb[35].mxu1 }
 0xa33   : > { %1483 = vst [vmem:[%s241_s25] sm:$0xff] %v1482_v14 }
 0xa34   : > { %2108 = shalt.err (!%p2105_p2)
}
 0xa35   : > { %s2109_s5 = scalar_lea.hbm %s2516_s24, 128  ;;  %s2113_s10 = scalar_lea.hbm %s2564_s4, 256 }
 0xa36   : > { %p2110_p13 = scmp.ne.s32.totalorder %s2516_s24, %s2109_s5  ;;  %p2114_p4 = scmp.lt.u32.totalorder %s2516_s24, %s2564_s4 }
 0xa37   : > { %p2115_p7 = scmp.lt.u32.totalorder %s2113_s10, %s2109_s5  ;;  %p2117_p8 = scmp.lt.u32.totalorder %s2109_s5, %s2516_s24 }
 0xa38   : > { %p2111_p6 = pnand %p2110_p13, %p2578_p0 }
 0xa39   : > { %p2116_p11 = por %p2115_p7, %p2114_p4 }
 0xa3a   : > { %p2112_p10 = pneg %p2111_p6 }
 0xa3b   : > { %p2118_p1 = por %p2117_p8, %p2116_p11 }
 0xa3d   : > { %p2119_p3 = pnand %p2118_p1, %p2112_p10 }
 0xa3f   : > { %2122 = shalt.err (!%p2119_p3)
}
 0xa40   : > { %1860 = dma.vmem_to_hbm [thread:$0]  (%p2578_p0), %s2518_s7, 128, %s2516_s24, %s1485_s26  }
 0xa41 PF: > { %s1510_s30 = sand.u32 1, %s2153_s15   ;;  %p2579_p5 = scmp.ne.s32.totalorder %s2569_s22, 0 }
 0xa42   : > { %p2580_p9 = scmp.ge.s32.totalorder %s2165_s18, 2  ;;  %s1511_s6 = scalar_lea.sflag [#allocation4], %s1510_s30 }
 0xa44   : > { %p1874_p12 = pnand %p2580_p9, %p2579_p5 }
 0xa46   : > { %2148 = dma.done.wait (!%p1874_p12), %s1511_s6, 128  }
 0xa47   : > { %2150 = vsyncadd (!%p1874_p12), %s1511_s6, 4294967168  ;;  %p18_p2 = scmp.ge.s32.totalorder %s2314_s11, 4   ;;  %s2581_s15 = smov %s2157_s16 }
 0xa48   : > { %s2582_s16 = smov %s2161_s17  ;;  %s2583_s17 = smov %s2323_s14 }
 0xa49   : > { %s2584_s18 = smov %s2314_s11  ;;  %20 = sbr.rel (!%p18_p2) target bundleno = 6 (0x6), region = 92 }
 0xa50   :  { %1516 = vsyncpa [#allocation3], 1 }
 0xa51   :  { %1518 = vsyncpa [#allocation3 + $0x1], 1 }
 0xa52   :  { %1519 = vsyncpa [#allocation6], 1 }
 0xa53   :  { %1520 = vsyncpa [#allocation4], 1 }
 0xa54   :  { %1522 = vsyncpa [#allocation4 + $0x1], 1 }

</bundles_post_ra>
